<compile_context>
chip_gen: v6e
topology: v6e:2x2x1
jax: 0.10.0
libtpu: 0.0.40
codegen_flags: <defaults>
</compile_context>

<pallas_src>
import jax
import jax.numpy as jnp
from jax.experimental import pallas as pl
from jax.experimental.pallas import tpu as pltpu


def _round_up(x, m):
    return ((x + m - 1) // m) * m


def _linear_sigmoid_kernel(x_ref, w_ref, b_ref, o_ref, acc_ref):
    # grid = (j over Cout tiles, i over B tiles, k over Cin tiles); k innermost.
    k = pl.program_id(2)

    @pl.when(k == 0)
    def _init():
        acc_ref[...] = jnp.zeros_like(acc_ref)

    acc_ref[...] += jnp.dot(x_ref[...], w_ref[...],
                            preferred_element_type=jnp.float32)

    @pl.when(k == pl.num_programs(2) - 1)
    def _finalize():
        y = acc_ref[...] + b_ref[...]          # bias applied once, in epilogue
        # Exact sigmoid: exp runs on the EUP; the divide is a per-tile epilogue
        # cost only, and keeps the result within ~1e-6 of the f32 reference.
        o_ref[...] = (1.0 / (1.0 + jnp.exp(-y))).astype(o_ref.dtype)


def _choose_tiles(B, Cin, Cout):
    # Sublane axis (B) multiple of 8; lane axes (Cin, Cout) multiples of 128.
    # Caps sized for v7x's smaller VMEM; also fine on v5e/v6e.
    tm = min(_round_up(B, 8), 256)
    tk = min(_round_up(Cin, 128), 512)
    tn = min(_round_up(Cout, 128), 512)
    return tm, tn, tk


@jax.jit
def linear_block_forward(x, w, b):
    """LinearBlock forward: sigmoid(x @ w.T + b).

    x: (B, Cin) f32, w: (Cout, Cin) f32 (PyTorch layout), b: (Cout,) f32.
    Returns (B, Cout) f32.
    """
    B, Cin = x.shape
    Cout = w.shape[0]
    tm, tn, tk = _choose_tiles(B, Cin, Cout)
    Bp = _round_up(B, tm)
    Kp = _round_up(Cin, tk)
    Np = _round_up(Cout, tn)

    # Pre-transpose weight to (Cin, Cout) so the kernel is a plain MXU matmul,
    # and zero-pad everything to tile multiples (zero rows/cols don't change
    # the matmul; padded output columns are sliced off below).
    x_p = jnp.pad(x, ((0, Bp - B), (0, Kp - Cin)))
    w_p = jnp.pad(jnp.transpose(w), ((0, Kp - Cin), (0, Np - Cout)))
    b_p = jnp.pad(b, (0, Np - Cout)).reshape(1, Np)

    grid = (Np // tn, Bp // tm, Kp // tk)

    out_p = pl.pallas_call(
        _linear_sigmoid_kernel,
        out_shape=jax.ShapeDtypeStruct((Bp, Np), jnp.float32),
        grid_spec=pltpu.PrefetchScalarGridSpec(
            num_scalar_prefetch=0,
            grid=grid,
            in_specs=[
                # x tile: depends on (i, k) only.
                pl.BlockSpec((tm, tk), lambda j, i, k: (i, k)),
                # weight tile: independent of the B axis (i) -> stays resident
                # in VMEM while the batch axis sweeps.
                pl.BlockSpec((tk, tn), lambda j, i, k: (k, j)),
                # bias tile: independent of both i and k.
                pl.BlockSpec((1, tn), lambda j, i, k: (0, j)),
            ],
            out_specs=pl.BlockSpec((tm, tn), lambda j, i, k: (i, j)),
            scratch_shapes=[pltpu.VMEM((tm, tn), jnp.float32)],
        ),
        compiler_params=pltpu.CompilerParams(
            dimension_semantics=("parallel", "parallel", "arbitrary"),
            vmem_limit_bytes=32 * 1024 * 1024,
        ),
    )(x_p, w_p, b_p)

    return out_p[:B, :Cout]


if __name__ == "__main__":
    key = jax.random.PRNGKey(0)

    def make_params(k, cin, cout):
        kw, kb = jax.random.split(k)
        bound = 1.0 / (cin ** 0.5)
        w = jax.random.uniform(kw, (cout, cin), jnp.float32, -bound, bound)
        b = jax.random.uniform(kb, (cout,), jnp.float32, -bound, bound)
        return w, b

    # --- Small demo shape: LinearBlock(32, 32), batch 8 (matches the module) ---
    k1, k2, key = jax.random.split(key, 3)
    B, Cin, Cout = 8, 32, 32
    w, b = make_params(k1, Cin, Cout)
    x = jax.random.normal(k2, (B, Cin), jnp.float32)

    out = linear_block_forward(x, w, b)
    jax.block_until_ready(out)

    ref = jax.nn.sigmoid(x @ w.T + b)
    assert out.shape == ref.shape
    assert float(jnp.max(jnp.abs(out - ref))) < 1e-4

    # --- Non-tile-aligned shape: exercises padding, multi-k accumulation path ---
    k3, k4 = jax.random.split(key)
    B2, Cin2, Cout2 = 24, 600, 200
    w2, b2 = make_params(k3, Cin2, Cout2)
    x2 = jax.random.normal(k4, (B2, Cin2), jnp.float32)

    out2 = linear_block_forward(x2, w2, b2)
    jax.block_until_ready(out2)

    ref2 = jax.nn.sigmoid(x2 @ w2.T + b2)
    assert out2.shape == ref2.shape
    assert float(jnp.max(jnp.abs(out2 - ref2))) < 1e-4

    print("KERNEL_OK")
</pallas_src>

<mosaic_0001>
module attributes {stable_mosaic.version = 11 : i64} {
  func.func @_linear_sigmoid_kernel(%arg0: i32, %arg1: i32, %arg2: i32, %arg3: memref<8x128xf32, #tpu.memory_space<vmem>>, %arg4: memref<128x128xf32, #tpu.memory_space<vmem>>, %arg5: memref<1x128xf32, #tpu.memory_space<vmem>>, %arg6: memref<8x128xf32, #tpu.memory_space<vmem>>, %arg7: memref<8x128xf32, #tpu.memory_space<vmem>>) attributes {dimension_semantics = [#tpu.dimension_semantics<parallel>, #tpu.dimension_semantics<parallel>, #tpu.dimension_semantics<arbitrary>], iteration_bounds = array<i64: 1, 1, 1>, scalar_prefetch = 0 : i64, scratch_operands = 1 : i64, tpu.core_type = #tpu.core_type<tc>, window_params = [{transform_indices = @transform_0, window_bounds = array<i64: 8, 128>}, {transform_indices = @transform_1, window_bounds = array<i64: 128, 128>}, {transform_indices = @transform_2, window_bounds = array<i64: 1, 128>}, {transform_indices = @transform_3, window_bounds = array<i64: 8, 128>}]} {
    %c0_i32 = arith.constant 0 : i32
    %0 = arith.cmpi eq, %arg2, %c0_i32 : i32
    %1 = arith.extui %0 : i1 to i32
    %c0_i32_0 = arith.constant 0 : i32
    %2 = arith.cmpi ne, %1, %c0_i32_0 : i32
    scf.if %2 {
      %cst_10 = arith.constant 0.000000e+00 : f32
      %12 = vector.broadcast %cst_10 : f32 to vector<8x128xf32>
      %c0_11 = arith.constant 0 : index
      %c0_12 = arith.constant 0 : index
      %13 = vector.load %arg7[%c0_11, %c0_12] : memref<8x128xf32, #tpu.memory_space<vmem>>, vector<8x128xf32>
      tpu.vector_store %arg7[%c0_11, %c0_12], %12 {strides = array<i32>} : memref<8x128xf32, #tpu.memory_space<vmem>>, vector<8x128xf32>,
    } else {
    }
    %c0 = arith.constant 0 : index
    %c0_1 = arith.constant 0 : index
    %3 = vector.load %arg7[%c0, %c0_1] : memref<8x128xf32, #tpu.memory_space<vmem>>, vector<8x128xf32>
    %c0_2 = arith.constant 0 : index
    %c0_3 = arith.constant 0 : index
    %4 = vector.load %arg3[%c0_2, %c0_3] : memref<8x128xf32, #tpu.memory_space<vmem>>, vector<8x128xf32>
    %c0_4 = arith.constant 0 : index
    %c0_5 = arith.constant 0 : index
    %5 = vector.load %arg4[%c0_4, %c0_5] : memref<128x128xf32, #tpu.memory_space<vmem>>, vector<128x128xf32>
    %cst = arith.constant dense<0.000000e+00> : vector<8x128xf32>
    %6 = tpu.matmul %4, %5, %cst {dimension_numbers = #tpu.dot_dimension_numbers<[1], [0], [0], [1], [0, 0, 1, 1], [], []>} : vector<8x128xf32>, vector<128x128xf32>, vector<8x128xf32> -> vector<8x128xf32>
    %7 = arith.addf %3, %6 : vector<8x128xf32>
    %c0_6 = arith.constant 0 : index
    %c0_7 = arith.constant 0 : index
    %8 = vector.load %arg7[%c0_6, %c0_7] : memref<8x128xf32, #tpu.memory_space<vmem>>, vector<8x128xf32>
    tpu.vector_store %arg7[%c0_6, %c0_7], %7 {strides = array<i32>} : memref<8x128xf32, #tpu.memory_space<vmem>>, vector<8x128xf32>,
    %c0_i32_8 = arith.constant 0 : i32
    %9 = arith.cmpi eq, %arg2, %c0_i32_8 : i32
    %10 = arith.extui %9 : i1 to i32
    %c0_i32_9 = arith.constant 0 : i32
    %11 = arith.cmpi ne, %10, %c0_i32_9 : i32
    scf.if %11 {
      %c0_10 = arith.constant 0 : index
      %c0_11 = arith.constant 0 : index
      %12 = vector.load %arg7[%c0_10, %c0_11] : memref<8x128xf32, #tpu.memory_space<vmem>>, vector<8x128xf32>
      %c0_12 = arith.constant 0 : index
      %c0_13 = arith.constant 0 : index
      %13 = vector.load %arg5[%c0_12, %c0_13] : memref<1x128xf32, #tpu.memory_space<vmem>>, vector<1x128xf32>
      %14 = vector.broadcast %13 : vector<1x128xf32> to vector<8x128xf32>
      %15 = arith.addf %12, %14 : vector<8x128xf32>
      %cst_14 = arith.constant 0.000000e+00 : f32
      %16 = vector.broadcast %cst_14 : f32 to vector<8x128xf32>
      %17 = arith.subf %16, %15 : vector<8x128xf32>
      %18 = math.exp %17 : vector<8x128xf32>
      %cst_15 = arith.constant 1.000000e+00 : f32
      %19 = vector.broadcast %cst_15 : f32 to vector<8x128xf32>
      %20 = arith.addf %19, %18 : vector<8x128xf32>
      %cst_16 = arith.constant 1.000000e+00 : f32
      %21 = vector.broadcast %cst_16 : f32 to vector<8x128xf32>
      %22 = arith.divf %21, %20 : vector<8x128xf32>
      %c0_17 = arith.constant 0 : index
      %c0_18 = arith.constant 0 : index
      %23 = vector.load %arg6[%c0_17, %c0_18] : memref<8x128xf32, #tpu.memory_space<vmem>>, vector<8x128xf32>
      tpu.vector_store %arg6[%c0_17, %c0_18], %22 {strides = array<i32>} : memref<8x128xf32, #tpu.memory_space<vmem>>, vector<8x128xf32>,
    } else {
    }
    return
  }
  func.func @transform_0(%arg0: i32, %arg1: i32, %arg2: i32) -> (i32, i32) {
    %c0_i32 = arith.constant 0 : i32
    return %arg1, %arg2 : i32, i32
  }
  func.func @transform_1(%arg0: i32, %arg1: i32, %arg2: i32) -> (i32, i32) {
    %c0_i32 = arith.constant 0 : i32
    return %arg2, %arg0 : i32, i32
  }
  func.func @transform_2(%arg0: i32, %arg1: i32, %arg2: i32) -> (i32, i32) {
    %c0_i32 = arith.constant 0 : i32
    %c0_i32_0 = arith.constant 0 : i32
    return %c0_i32, %arg0 : i32, i32
  }
  func.func @transform_3(%arg0: i32, %arg1: i32, %arg2: i32) -> (i32, i32) {
    %c0_i32 = arith.constant 0 : i32
    return %arg1, %arg0 : i32, i32
  }
}

</mosaic_0001>

<bundles_post_ra>
// kernel: linear_block_forward.1
= control target key start
LH: loop header
LB: loop body
LE: loop exit
PB: predicated region body
PF: predicated region fallthrough
CT: control target
= control target key end

     0   :  { %v225_v1 = vmov 0.0   ;;  %vm226_vm0 = vmmov 0   ;;  %s305_s0 = inlined_call_operand.vmem [shape: f32[8,128], index: 0, kind: input, shape index: {}]   ;;  %s306_s1 = inlined_call_operand.vmem [shape: f32[128,128], index: 1, kind: input, shape index: {}]   ;;  %s307_s2 = inlined_call_operand.vmem [shape: f32[1,128], index: 2, kind: input, shape index: {}]   ;;  %s308_s3 = inlined_call_operand.hbm [shape: f32[8,128], index: 3, kind: output, shape index: {}]  }
   0x1   :  { %v37_v0 = vld [vmem:[%s306_s1 + $0x78] sm:$0xff]  ;;  %161 = vmatprep.subr.mxu0 %v225_v1  ;;  %v36_v2 = vld [vmem:[%s306_s1 + $0x70] sm:$0xff]  ;;  %193 = vmatprep.mubr.msk.f32.mxu0 %vm226_vm0, %v225_v1  ;;  %v35_v3 = vld [vmem:[%s306_s1 + $0x68] sm:$0xff] }
   0x2   :  { %162 = vmatpush3.msra.mxu0 %v37_v0  ;;  %v34_v4 = vld [vmem:[%s306_s1 + $0x60] sm:$0xff] }
   0x3   :  { %163 = vmatprep.subr.mxu0 %v225_v1 }
   0x4   :  { %164 = vmatpush3.msra.mxu0 %v36_v2 }
   0x5   :  { %165 = vmatprep.subr.mxu0 %v225_v1 }
   0x6   :  { %8 = vsyncpa [#allocation4], 0  ;;  %166 = vmatpush3.msra.mxu0 %v35_v3  ;;  %v33_v5 = vld [vmem:[%s306_s1 + $0x58] sm:$0xff]  ;;  %v32_v6 = vld [vmem:[%s306_s1 + $0x50] sm:$0xff] }
   0x7   :  { %167 = vmatprep.subr.mxu0 %v225_v1  ;;  %v31_v7 = vld [vmem:[%s306_s1 + $0x48] sm:$0xff]  ;;  %v30_v8 = vld [vmem:[%s306_s1 + $0x40] sm:$0xff]  ;;  %v29_v9 = vld [vmem:[%s306_s1 + $0x38] sm:$0xff] }
   0x8   :  { %168 = vmatpush3.msra.mxu0 %v34_v4  ;;  %v28_v10 = vld [vmem:[%s306_s1 + $0x30] sm:$0xff]  ;;  %v27_v11 = vld [vmem:[%s306_s1 + $0x28] sm:$0xff]  ;;  %v26_v12 = vld [vmem:[%s306_s1 + $0x20] sm:$0xff] }
   0x9   :  { %169 = vmatprep.subr.mxu0 %v225_v1  ;;  %v25_v13 = vld [vmem:[%s306_s1 + $0x18] sm:$0xff]  ;;  %v24_v14 = vld [vmem:[%s306_s1 + $0x10] sm:$0xff]  ;;  %v23_v15 = vld [vmem:[%s306_s1 + $0x8] sm:$0xff] }
   0xa   :  { %170 = vmatpush3.msra.mxu0 %v33_v5  ;;  %v22_v16 = vld [vmem:[%s306_s1] sm:$0xff]  ;;  %s227_s1 = smov [#allocation3]  }
   0xb   :  { %171 = vmatprep.subr.mxu0 %v225_v1  ;;  %v21_v17 = vld [vmem:[%s305_s0] sm:$0xff]  ;;  %s135_s21 = sshll.u32 %s227_s1, 4  ;;  %s136_s21 = int_to_ptr.vmem [resolvable:$true] %s135_s21 }
   0xc   :  { %172 = vmatpush3.msra.mxu0 %v32_v6  ;;  %v143_v18 = vld [vmem:[%s307_s2] ss:$0 sm:$0xff]  ;;  %s203_s0 = scalar_lea.vmem %s136_s21, 128  ;;  %p208_p1 = scmp.lt.s32.totalorder %s136_s21, %s136_s21 }
   0xd   :  { %173 = vmatprep.subr.mxu0 %v225_v1  ;;  %p204_p0 = scmp.ne.s32.totalorder %s136_s21, %s203_s0  ;;  %p209_p2 = scmp.lt.s32.totalorder %s203_s0, %s203_s0 }
   0xe   :  { %174 = vmatpush3.msra.mxu0 %v31_v7 }
   0xf   :  { %175 = vmatprep.subr.mxu0 %v225_v1  ;;  %p210_p3 = por %p209_p2, %p208_p1 }
  0x10   :  { %176 = vmatpush3.msra.mxu0 %v30_v8 }
  0x11   :  { %177 = vmatprep.subr.mxu0 %v225_v1  ;;  %p211_p4 = pnand %p210_p3, %p204_p0 }
  0x12   :  { %178 = vmatpush3.msra.mxu0 %v29_v9 }
  0x13   :  { %179 = vmatprep.subr.mxu0 %v225_v1 }
  0x14   :  { %180 = vmatpush3.msra.mxu0 %v28_v10 }
  0x15   :  { %181 = vmatprep.subr.mxu0 %v225_v1 }
  0x16   :  { %182 = vmatpush3.msra.mxu0 %v27_v11 }
  0x17   :  { %183 = vmatprep.subr.mxu0 %v225_v1 }
  0x18   :  { %184 = vmatpush3.msra.mxu0 %v26_v12 }
  0x19   :  { %185 = vmatprep.subr.mxu0 %v225_v1 }
  0x1a   :  { %186 = vmatpush3.msra.mxu0 %v25_v13 }
  0x1b   :  { %187 = vmatprep.subr.mxu0 %v225_v1 }
  0x1c   :  { %188 = vmatpush3.msra.mxu0 %v24_v14 }
  0x1d   :  { %189 = vmatprep.subr.mxu0 %v225_v1 }
  0x1e   :  { %190 = vmatpush3.msra.mxu0 %v23_v15 }
  0x1f   :  { %191 = vmatprep.subr.mxu0 %v225_v1 }
  0x20   :  { %192 = vmatpush3.msra.mxu0 %v22_v16 }
  0x21   :  { %194 = vmatmul.mubr.f32.vlgmr.msra.gmra.mxu0 %v21_v17 }
  0xe1   :  { %v104_v19 = vpop.f32.mrf.mxu0 }
  0xe2   :  { %v121_v20 = vadd.f32 %v143_v18, %v104_v19 }
  0xe3   :  { %v195_v21 = vpop.f32.mrf.mxu0 }
  0xe4   :  { %v122_v22 = vsub.f32 0.0, %v121_v20 }
  0xe6   :  { %v123_v23 = vmul.f32 1.442695, %v122_v22 }
  0xe8   :  { %199 = vpow2.f32 %v123_v23 }
  0xf5   :  { %v200_v24 = vpop.eup %199 }
  0xf6   :  { %v125_v25 = vadd.f32 1.0, %v200_v24 }
  0xf8   :  { %201 = vrcp.f32 %v125_v25 }
 0x105   :  { %v202_v26 = vpop.eup %201 }
 0x106   :  { %128 = vst [vmem:[#allocation3] sm:$0xff] %v202_v26 }
 0x107   :  { %214 = shalt.err (!%p211_p4)
}
 0x108   :  { %138 = dma.vmem_to_hbm [thread:$0]  %s136_s21, 128, %s308_s3, [#allocation4]  }
 0x109   :  { %223 = dma.done.wait [#allocation4], 128  }
 0x10a   :  { %224 = vsyncadd [#allocation4], 4294967168 }
 0x10b   :  { %142 = vsyncpa [#allocation4], 1 }

</bundles_post_ra>
